<compile_context>
chip_gen: v5e
topology: v5e:2x2
jax: 0.10.0
libtpu: 0.0.40
codegen_flags: <defaults>
</compile_context>

<pallas_src>
import functools
import math

import jax
import jax.numpy as jnp
from jax.experimental import pallas as pl
from jax.experimental.pallas import tpu as pltpu


def _round_up(n, m):
    return ((n + m - 1) // m) * m


def _device_vmem_and_gen():
    """Return (vmem_bytes_per_core, is_v7x) with conservative fallbacks."""
    kind = ""
    try:
        kind = jax.devices()[0].device_kind.lower()
    except Exception:
        pass
    is_v7x = "v7" in kind
    vmem = None
    try:
        info = pltpu.get_tpu_info()
        vmem = int(getattr(info, "vmem_capacity_bytes"))
    except Exception:
        vmem = None
    if vmem is None:
        if is_v7x:
            vmem = 64 * 1024 * 1024
        elif ("v5" in kind) or ("v6" in kind):
            vmem = 128 * 1024 * 1024
        else:
            vmem = 64 * 1024 * 1024          # unknown generation: be conservative
    return vmem, is_v7x


def _ffn_kernel(x_ref, w13_ref, w2_ref, o_ref, acc_ref):
    # x_ref:   (tm, dim)         current M tile of activations
    # w13_ref: (dim, 2*th)       fused [w1 | w3] hidden tile, (K, N) layout
    # w2_ref:  (th, dim)         w2 hidden tile, (K, N) layout
    # o_ref:   (tm, dim)         output tile (written on last hidden step)
    # acc_ref: (tm, dim) f32     VMEM accumulator across hidden tiles
    h = pl.program_id(1)

    @pl.when(h == 0)
    def _init():
        acc_ref[...] = jnp.zeros_like(acc_ref)

    th = w2_ref.shape[0]
    # (tm, dim) . (dim, 2*th) -> (tm, 2*th); single MXU matmul, f32 accumulation.
    h13 = jnp.dot(x_ref[...], w13_ref[...], preferred_element_type=jnp.float32)
    h1 = h13[:, :th]          # static, lane-aligned (th is a multiple of 128)
    h3 = h13[:, th:]
    gated = (h1 * jax.nn.sigmoid(h1)) * h3            # SiLU gate in f32
    # (tm, th) . (th, dim) -> (tm, dim), accumulated across hidden tiles.
    acc_ref[...] += jnp.dot(gated.astype(w2_ref.dtype), w2_ref[...],
                            preferred_element_type=jnp.float32)

    @pl.when(h == pl.num_programs(1) - 1)
    def _finalize():
        o_ref[...] = acc_ref[...].astype(o_ref.dtype)


@functools.partial(jax.jit, static_argnames=("tm_target", "th", "vmem_limit"))
def _ffn_forward(x, w13, w2t, *, tm_target, th, vmem_limit):
    *lead, dim = x.shape
    M = math.prod(lead) if lead else 1
    H_pad = w2t.shape[0]
    x2d = x.reshape(M, dim)

    act_bytes = jnp.dtype(x.dtype).itemsize
    w_bytes = jnp.dtype(w13.dtype).itemsize
    sub = 16 if act_bytes == 2 else 8                 # bf16 packs 16 sublanes
    tm_eff = tm_target if M >= tm_target else _round_up(M, sub)
    M_pad = _round_up(M, tm_eff)

    # Zero padding of M is exact for SwiGLU (silu(0)*0 == 0); padded rows are
    # sliced off below.  Weights were padded once at construction time.
    x_p = jnp.pad(x2d, ((0, M_pad - M), (0, 0))) if M_pad != M else x2d
    grid = (M_pad // tm_eff, H_pad // th)

    cost = pl.CostEstimate(
        flops=6 * M_pad * dim * H_pad,
        transcendentals=M_pad * H_pad,
        bytes_accessed=(2 * M_pad * dim * act_bytes               # x in + out
                        + grid[0] * 3 * H_pad * dim * w_bytes),   # weights per M tile
    )

    out2d = pl.pallas_call(
        _ffn_kernel,
        out_shape=jax.ShapeDtypeStruct((M_pad, dim), x.dtype),
        grid_spec=pltpu.PrefetchScalarGridSpec(
            num_scalar_prefetch=0,
            grid=grid,
            in_specs=[
                pl.BlockSpec((tm_eff, dim), lambda i, h: (i, 0)),   # x
                pl.BlockSpec((dim, 2 * th), lambda i, h: (0, h)),   # fused w1|w3
                pl.BlockSpec((th, dim), lambda i, h: (h, 0)),       # w2 (K, N)
            ],
            out_specs=pl.BlockSpec((tm_eff, dim), lambda i, h: (i, 0)),
            scratch_shapes=[pltpu.VMEM((tm_eff, dim), jnp.float32)],
        ),
        compiler_params=pltpu.CompilerParams(
            dimension_semantics=("parallel", "arbitrary"),
            vmem_limit_bytes=int(vmem_limit),
        ),
        cost_estimate=cost,
    )(x_p, w13, w2t)

    out = out2d[:M] if M_pad != M else out2d
    return out.reshape(*lead, dim)


class FeedForwardPallas:
    """SwiGLU FFN: out = w2(silu(w1 x) * w3 x).  One-time weight re-layout."""

    def __init__(self, w1, w2, w3, *, tm=None, th=None):
        # nn.Linear native layouts: w1/w3 (hidden, dim), w2 (dim, hidden).
        hidden, dim = w1.shape
        assert w3.shape == (hidden, dim) and w2.shape == (dim, hidden)
        self.dim, self.hidden = dim, hidden

        w_bytes = jnp.dtype(w1.dtype).itemsize
        vmem_bytes, is_v7x = _device_vmem_and_gen()

        # Generation-specific tile targets (roofline: weights re-streamed once
        # per M tile -> big tm; th bounded by VMEM / accumulator traffic).
        tm_target = tm if tm is not None else (512 if is_v7x else 1024)
        th_target = th if th is not None else (512 if is_v7x else 1024)
        tm_target = max(16, _round_up(tm_target, 16))
        th_target = max(128, _round_up(th_target, 128))
        th_eff = min(th_target, _round_up(hidden, 128))

        budget = int(vmem_bytes * 0.85)

        def footprint(tm_, th_):
            io = 2 * 2 * tm_ * dim * 4                    # x + out, double-buffered (f32 worst case)
            wts = 2 * (3 * th_ * dim) * w_bytes           # w13 (2*th*dim) + w2 (th*dim), double-buffered
            acc = tm_ * dim * 4                           # resident f32 accumulator
            interm = 3 * tm_ * th_ * 4                    # h13 + gated f32 temporaries
            return io + wts + acc + interm + (2 << 20)

        tm_eff = tm_target
        # Shrink th first (keeps weight-reuse / arithmetic intensity), then tm.
        while footprint(tm_eff, th_eff) > budget and th_eff > 128:
            th_eff -= 128
        while footprint(tm_eff, th_eff) > budget and tm_eff > 16:
            tm_eff = tm_eff - 128 if tm_eff > 128 else max(16, tm_eff // 2)

        self.tm_target = tm_eff
        self.th = th_eff
        fp = footprint(tm_eff, th_eff)
        self.vmem_limit = int(min(vmem_bytes * 9 // 10,
                                  max(32 * 1024 * 1024, fp + (4 << 20))))

        # --- one-time weight re-layout (NOT per call) -------------------------
        # Pad hidden once so th divides it (zero pad is exact for SwiGLU), put
        # weights in MXU-canonical (K, N) layout, and block-interleave w1/w3 so
        # each hidden tile of the fused matrix is [w1_block | w3_block].
        H_pad = _round_up(hidden, th_eff)
        ph = H_pad - hidden
        w1t = (jnp.pad(w1, ((0, ph), (0, 0))) if ph else w1).T    # (dim, H_pad)
        w3t = (jnp.pad(w3, ((0, ph), (0, 0))) if ph else w3).T    # (dim, H_pad)
        n_h = H_pad // th_eff
        w13 = jnp.concatenate(
            [w1t.reshape(dim, n_h, th_eff), w3t.reshape(dim, n_h, th_eff)],
            axis=2).reshape(dim, 2 * H_pad)
        w2t = (jnp.pad(w2, ((0, 0), (0, ph))) if ph else w2).T    # (H_pad, dim)

        self.w13 = jax.device_put(w13)
        self.w2t = jax.device_put(w2t)

    def __call__(self, x):
        return _ffn_forward(x, self.w13, self.w2t,
                            tm_target=self.tm_target, th=self.th,
                            vmem_limit=self.vmem_limit)


def _ref_feed_forward(x, w1, w2, w3):
    h1 = jnp.einsum("bsd,hd->bsh", x, w1)
    h3 = jnp.einsum("bsd,hd->bsh", x, w3)
    g = (h1 * jax.nn.sigmoid(h1)) * h3
    return jnp.einsum("bsh,dh->bsd", g, w2)


def _make_params(key, dim, hidden_dim, multiple_of, dtype=jnp.float32):
    # Mirrors FeedForward.__init__: hidden resize + bias-free nn.Linear init.
    hidden = int(2 * hidden_dim / 3)
    hidden = multiple_of * ((hidden + multiple_of - 1) // multiple_of)
    k1, k2, k3 = jax.random.split(key, 3)
    b_in = 1.0 / math.sqrt(dim)
    b_h = 1.0 / math.sqrt(hidden)
    w1 = jax.random.uniform(k1, (hidden, dim), dtype, minval=-b_in, maxval=b_in)
    w3 = jax.random.uniform(k3, (hidden, dim), dtype, minval=-b_in, maxval=b_in)
    w2 = jax.random.uniform(k2, (dim, hidden), dtype, minval=-b_h, maxval=b_h)
    return w1, w2, w3


if __name__ == "__main__":
    key = jax.random.PRNGKey(0)
    kx1, kw1 = jax.random.split(key)

    # --- test 1: single-tile path (dim=64, hidden=96, batch=2, seq=8) --------
    dim, hidden_dim_in, multiple_of = 64, 128, 32
    batch, seq = 2, 8
    x = jax.random.normal(kx1, (batch, seq, dim), jnp.float32)
    w1, w2, w3 = _make_params(kw1, dim, hidden_dim_in, multiple_of)
    ffn = FeedForwardPallas(w1, w2, w3)
    out = ffn(x)
    jax.block_until_ready(out)
    ref = _ref_feed_forward(x, w1, w2, w3)
    assert out.shape == (batch, seq, dim)
    assert jnp.allclose(out, ref, atol=1e-4, rtol=1e-4)

    # --- test 2: multi-tile path (M tiling + padding, hidden accumulation) ---
    kx2, kw2 = jax.random.split(kw1)
    dim2, hidden_dim_in2, multiple_of2 = 64, 384, 32      # -> hidden = 256
    batch2, seq2 = 2, 9                                    # M = 18 (ragged)
    x2 = jax.random.normal(kx2, (batch2, seq2, dim2), jnp.float32)
    w1b, w2b, w3b = _make_params(kw2, dim2, hidden_dim_in2, multiple_of2)
    ffn2 = FeedForwardPallas(w1b, w2b, w3b, tm=16, th=128)  # grid = (2, 2)
    out2 = ffn2(x2)
    jax.block_until_ready(out2)
    ref2 = _ref_feed_forward(x2, w1b, w2b, w3b)
    assert jnp.allclose(out2, ref2, atol=1e-4, rtol=1e-4)

    # --- test 3: bf16 MXU path (f32 gate + f32 accumulation in-kernel) -------
    xb = x.astype(jnp.bfloat16)
    w1c, w2c, w3c = (w.astype(jnp.bfloat16) for w in (w1, w2, w3))
    ffn3 = FeedForwardPallas(w1c, w2c, w3c)
    out3 = ffn3(xb)
    jax.block_until_ready(out3)
    ref3 = _ref_feed_forward(xb.astype(jnp.float32),
                             w1.astype(jnp.bfloat16).astype(jnp.float32),
                             w2.astype(jnp.bfloat16).astype(jnp.float32),
                             w3.astype(jnp.bfloat16).astype(jnp.float32))
    assert jnp.allclose(out3.astype(jnp.float32), ref3, atol=5e-2, rtol=5e-2)

    print("KERNEL_OK")
</pallas_src>

<mosaic_0001>
module attributes {stable_mosaic.version = 11 : i64} {
  func.func @_ffn_kernel(%arg0: i32, %arg1: i32, %arg2: memref<16x64xf32, #tpu.memory_space<vmem>>, %arg3: memref<64x256xf32, #tpu.memory_space<vmem>>, %arg4: memref<128x64xf32, #tpu.memory_space<vmem>>, %arg5: memref<16x64xf32, #tpu.memory_space<vmem>>, %arg6: memref<16x64xf32, #tpu.memory_space<vmem>>) attributes {dimension_semantics = [#tpu.dimension_semantics<parallel>, #tpu.dimension_semantics<arbitrary>], iteration_bounds = array<i64: 1, 1>, scalar_prefetch = 0 : i64, scratch_operands = 1 : i64, tpu.core_type = #tpu.core_type<tc>, window_params = [{transform_indices = @transform_0, window_bounds = array<i64: 16, 64>}, {transform_indices = @transform_1, window_bounds = array<i64: 64, 256>}, {transform_indices = @transform_2, window_bounds = array<i64: 128, 64>}, {transform_indices = @transform_3, window_bounds = array<i64: 16, 64>}]} {
    %c0_i32 = arith.constant 0 : i32
    %0 = arith.cmpi eq, %arg1, %c0_i32 : i32
    %1 = arith.extui %0 : i1 to i32
    %c0_i32_0 = arith.constant 0 : i32
    %2 = arith.cmpi ne, %1, %c0_i32_0 : i32
    scf.if %2 {
      %cst_14 = arith.constant 0.000000e+00 : f32
      %23 = vector.broadcast %cst_14 : f32 to vector<16x64xf32>
      %c0_15 = arith.constant 0 : index
      %c0_16 = arith.constant 0 : index
      %24 = vector.load %arg6[%c0_15, %c0_16] : memref<16x64xf32, #tpu.memory_space<vmem>>, vector<16x64xf32>
      tpu.vector_store %arg6[%c0_15, %c0_16], %23 {strides = array<i32>} : memref<16x64xf32, #tpu.memory_space<vmem>>, vector<16x64xf32>,
    } else {
    }
    %c0 = arith.constant 0 : index
    %c0_1 = arith.constant 0 : index
    %3 = vector.load %arg2[%c0, %c0_1] : memref<16x64xf32, #tpu.memory_space<vmem>>, vector<16x64xf32>
    %c0_2 = arith.constant 0 : index
    %c0_3 = arith.constant 0 : index
    %4 = vector.load %arg3[%c0_2, %c0_3] : memref<64x256xf32, #tpu.memory_space<vmem>>, vector<64x256xf32>
    %cst = arith.constant dense<0.000000e+00> : vector<16x256xf32>
    %5 = tpu.matmul %3, %4, %cst {dimension_numbers = #tpu.dot_dimension_numbers<[1], [0], [0], [1], [0, 0, 1, 1], [], []>} : vector<16x64xf32>, vector<64x256xf32>, vector<16x256xf32> -> vector<16x256xf32>
    %6 = vector.extract_strided_slice %5 {offsets = [0, 0], sizes = [16, 128], strides = [1, 1]} : vector<16x256xf32> to vector<16x128xf32>
    %7 = vector.extract_strided_slice %5 {offsets = [0, 128], sizes = [16, 128], strides = [1, 1]} : vector<16x256xf32> to vector<16x128xf32>
    %8 = arith.negf %6 : vector<16x128xf32>
    %9 = math.exp %8 : vector<16x128xf32>
    %cst_4 = arith.constant 1.000000e+00 : f32
    %10 = vector.broadcast %cst_4 : f32 to vector<16x128xf32>
    %11 = arith.addf %10, %9 : vector<16x128xf32>
    %12 = arith.divf %10, %11 : vector<16x128xf32>
    %13 = arith.mulf %6, %12 : vector<16x128xf32>
    %14 = arith.mulf %13, %7 : vector<16x128xf32>
    %c0_5 = arith.constant 0 : index
    %c0_6 = arith.constant 0 : index
    %15 = vector.load %arg6[%c0_5, %c0_6] : memref<16x64xf32, #tpu.memory_space<vmem>>, vector<16x64xf32>
    %c0_7 = arith.constant 0 : index
    %c0_8 = arith.constant 0 : index
    %16 = vector.load %arg4[%c0_7, %c0_8] : memref<128x64xf32, #tpu.memory_space<vmem>>, vector<128x64xf32>
    %cst_9 = arith.constant dense<0.000000e+00> : vector<16x64xf32>
    %17 = tpu.matmul %14, %16, %cst_9 {dimension_numbers = #tpu.dot_dimension_numbers<[1], [0], [0], [1], [0, 0, 1, 1], [], []>} : vector<16x128xf32>, vector<128x64xf32>, vector<16x64xf32> -> vector<16x64xf32>
    %18 = arith.addf %15, %17 : vector<16x64xf32>
    %c0_10 = arith.constant 0 : index
    %c0_11 = arith.constant 0 : index
    %19 = vector.load %arg6[%c0_10, %c0_11] : memref<16x64xf32, #tpu.memory_space<vmem>>, vector<16x64xf32>
    tpu.vector_store %arg6[%c0_10, %c0_11], %18 {strides = array<i32>} : memref<16x64xf32, #tpu.memory_space<vmem>>, vector<16x64xf32>,
    %c0_i32_12 = arith.constant 0 : i32
    %20 = arith.cmpi eq, %arg1, %c0_i32_12 : i32
    %21 = arith.extui %20 : i1 to i32
    %c0_i32_13 = arith.constant 0 : i32
    %22 = arith.cmpi ne, %21, %c0_i32_13 : i32
    scf.if %22 {
      %c0_14 = arith.constant 0 : index
      %c0_15 = arith.constant 0 : index
      %23 = vector.load %arg6[%c0_14, %c0_15] : memref<16x64xf32, #tpu.memory_space<vmem>>, vector<16x64xf32>
      %c0_16 = arith.constant 0 : index
      %c0_17 = arith.constant 0 : index
      %24 = vector.load %arg5[%c0_16, %c0_17] : memref<16x64xf32, #tpu.memory_space<vmem>>, vector<16x64xf32>
      tpu.vector_store %arg5[%c0_16, %c0_17], %23 {strides = array<i32>} : memref<16x64xf32, #tpu.memory_space<vmem>>, vector<16x64xf32>,
    } else {
    }
    return
  }
  func.func @transform_0(%arg0: i32, %arg1: i32) -> (i32, i32) {
    %c0_i32 = arith.constant 0 : i32
    %c0_i32_0 = arith.constant 0 : i32
    return %arg0, %c0_i32 : i32, i32
  }
  func.func @transform_1(%arg0: i32, %arg1: i32) -> (i32, i32) {
    %c0_i32 = arith.constant 0 : i32
    %c0_i32_0 = arith.constant 0 : i32
    return %c0_i32, %arg1 : i32, i32
  }
  func.func @transform_2(%arg0: i32, %arg1: i32) -> (i32, i32) {
    %c0_i32 = arith.constant 0 : i32
    %c0_i32_0 = arith.constant 0 : i32
    return %arg1, %c0_i32 : i32, i32
  }
  func.func @transform_3(%arg0: i32, %arg1: i32) -> (i32, i32) {
    %c0_i32 = arith.constant 0 : i32
    %c0_i32_0 = arith.constant 0 : i32
    return %arg0, %c0_i32 : i32, i32
  }
}

</mosaic_0001>

<bundles_post_ra>
// kernel: _ffn_forward.1
= control target key start
LH: loop header
LB: loop body
LE: loop exit
PB: predicated region body
PF: predicated region fallthrough
CT: control target
= control target key end

     0   :  { %s404_s0 = inlined_call_operand.vmem [shape: f32[16,64], index: 0, kind: input, shape index: {}]   ;;  %s405_s1 = inlined_call_operand.vmem [shape: f32[64,256], index: 1, kind: input, shape index: {}]   ;;  %s406_s2 = inlined_call_operand.vmem [shape: f32[128,64], index: 2, kind: input, shape index: {}]   ;;  %s407_s3 = inlined_call_operand.hbm [shape: f32[16,64], index: 3, kind: output, shape index: {}]  }
   0x1   :  { %v38_v0 = vld [vmem:[%s405_s1 + $0x70] sm:$0xff]  ;;  %v36_v1 = vld [vmem:[%s405_s1 + $0x60] sm:$0xff]  ;;  %v39_v3 = vld [vmem:[%s405_s1 + $0x78] sm:$0xff] }
   0x2   :  { %55 = vmatpush.msra.mxu0 %v38_v0  ;;  %v34_v2 = vld [vmem:[%s405_s1 + $0x50] sm:$0xff]  ;;  %v37_v4 = vld [vmem:[%s405_s1 + $0x68] sm:$0xff]  ;;  %v32_v5 = vld [vmem:[%s405_s1 + $0x40] sm:$0xff]  ;;  %78 = vmatpush.msra.mxu1 %v39_v3 }
   0x3   :  { %v35_v6 = vld [vmem:[%s405_s1 + $0x58] sm:$0xff]  ;;  %v30_v7 = vld [vmem:[%s405_s1 + $0x30] sm:$0xff] }
   0x4   :  { %56 = vmatpush.msra.mxu0 %v36_v1  ;;  %79 = vmatpush.msra.mxu1 %v37_v4 }
   0x6   :  { %57 = vmatpush.msra.mxu0 %v34_v2 }
   0x7   :  { %8 = vsyncpa [#allocation4], 0  ;;  %v33_v8 = vld [vmem:[%s405_s1 + $0x48] sm:$0xff]  ;;  %v28_v9 = vld [vmem:[%s405_s1 + $0x20] sm:$0xff]  ;;  %80 = vmatpush.msra.mxu1 %v35_v6  ;;  %vm19_vm0 = vcmask 523264   ;;  %v265_v40 = vmov 0.0  }
   0x8   :  { %58 = vmatpush.msra.mxu0 %v32_v5  ;;  %v31_v10 = vld [vmem:[%s405_s1 + $0x38] sm:$0xff]  ;;  %v26_v11 = vld [vmem:[%s405_s1 + $0x10] sm:$0xff]  ;;  %v29_v12 = vld [vmem:[%s405_s1 + $0x28] sm:$0xff]  ;;  %20 = vst.msk [vmem:[#allocation2] sm:$0xff] %vm19_vm0, %v265_v40  ;;  %s267_s26 = smov 128   ;;  %s268_s27 = smov 8  }
   0x9   :  { %81 = vmatpush.msra.mxu1 %v33_v8  ;;  %v24_v13 = vld [vmem:[%s405_s1] sm:$0xff]  ;;  %v27_v15 = vld [vmem:[%s405_s1 + $0x18] sm:$0xff]  ;;  %v25_v16 = vld [vmem:[%s405_s1 + $0x8] sm:$0xff]  ;;  %21 = vst.msk [vmem:[#allocation2 + $0x8] sm:$0xff] %vm19_vm0, %v265_v40 }
   0xa   :  { %59 = vmatpush.msra.mxu0 %v30_v7  ;;  %v22_v14 = vld [vmem:[%s404_s0] sm:$0xff]  ;;  %v23_v17 = vld [vmem:[%s404_s0 + $0x8] sm:$0xff]  ;;  %v152_v18 = vld [vmem:[%s406_s2 + $0x78] sm:$0xff]  ;;  %s193_s0 = sshll.u32 %s407_s3, 4  ;;  %s194_s0 = int_to_ptr.hbm [resolvable:$true] %s193_s0 }
   0xb   :  { %82 = vmatpush.msra.mxu1 %v31_v10  ;;  %153 = vmatpush.msra.mxu2 %v152_v18  ;;  %v151_v19 = vld [vmem:[%s406_s2 + $0x70] sm:$0xff]  ;;  %v150_v20 = vld [vmem:[%s406_s2 + $0x68] sm:$0xff]  ;;  %v149_v21 = vld [vmem:[%s406_s2 + $0x60] sm:$0xff] }
   0xc   :  { %60 = vmatpush.msra.mxu0 %v28_v9  ;;  %211 = vmatpush.msra.mxu3 %v152_v18  ;;  %v148_v22 = vld [vmem:[%s406_s2 + $0x58] sm:$0xff]  ;;  %v147_v23 = vld [vmem:[%s406_s2 + $0x50] sm:$0xff]  ;;  %v146_v24 = vld [vmem:[%s406_s2 + $0x48] sm:$0xff] }
   0xd   :  { %83 = vmatpush.msra.mxu1 %v29_v12  ;;  %154 = vmatpush.msra.mxu2 %v151_v19  ;;  %v145_v25 = vld [vmem:[%s406_s2 + $0x40] sm:$0xff]  ;;  %v144_v26 = vld [vmem:[%s406_s2 + $0x38] sm:$0xff]  ;;  %v143_v27 = vld [vmem:[%s406_s2 + $0x30] sm:$0xff] }
   0xe   :  { %61 = vmatpush.msra.mxu0 %v26_v11  ;;  %212 = vmatpush.msra.mxu3 %v151_v19  ;;  %v142_v28 = vld [vmem:[%s406_s2 + $0x28] sm:$0xff]  ;;  %v141_v29 = vld [vmem:[%s406_s2 + $0x20] sm:$0xff]  ;;  %v140_v30 = vld [vmem:[%s406_s2 + $0x18] sm:$0xff] }
   0xf   :  { %84 = vmatpush.msra.mxu1 %v27_v15  ;;  %155 = vmatpush.msra.mxu2 %v150_v20  ;;  %v139_v31 = vld [vmem:[%s406_s2 + $0x10] sm:$0xff]  ;;  %v138_v32 = vld [vmem:[%s406_s2 + $0x8] sm:$0xff]  ;;  %v137_v33 = vld [vmem:[%s406_s2] sm:$0xff]  ;;  %s266_s2 = smov [#allocation3]  }
  0x10   :  { %62 = vmatpush.msra.mxu0 %v24_v13  ;;  %213 = vmatpush.msra.mxu3 %v150_v20  ;;  %v135_v5 = vld [vmem:[#allocation2] sm:$0xff]  ;;  %v136_v8 = vld [vmem:[#allocation2 + $0x8] sm:$0xff]  ;;  %s191_s23 = sshll.u32 %s266_s2, 4  ;;  %s192_s23 = int_to_ptr.vmem [resolvable:$true] %s191_s23 }
  0x11   :  { %205 = vmatmul.msk.f32.vlgmr.msra.gmra.mxu0 %vm19_vm0, %v22_v14  ;;  %85 = vmatpush.msra.mxu1 %v25_v16 }
  0x12   :  { %207 = vmatmul.msk.f32.vlgmr.msra.gmra.mxu1 %vm19_vm0, %v22_v14  ;;  %156 = vmatpush.msra.mxu2 %v149_v21 }
  0x13   :  { %214 = vmatpush.msra.mxu3 %v149_v21 }
  0x14   :  { %157 = vmatpush.msra.mxu2 %v148_v22 }
  0x15   :  { %215 = vmatpush.msra.mxu3 %v148_v22 }
  0x16   :  { %158 = vmatpush.msra.mxu2 %v147_v23 }
  0x17   :  { %216 = vmatpush.msra.mxu3 %v147_v23 }
  0x18   :  { %159 = vmatpush.msra.mxu2 %v146_v24 }
  0x19   :  { %206 = vmatmul.msk.f32.gmra.mxu0 %vm19_vm0, %v23_v17  ;;  %217 = vmatpush.msra.mxu3 %v146_v24 }
  0x1a   :  { %208 = vmatmul.msk.f32.gmra.mxu1 %vm19_vm0, %v23_v17  ;;  %160 = vmatpush.msra.mxu2 %v145_v25 }
  0x1b   :  { %218 = vmatpush.msra.mxu3 %v145_v25 }
  0x1c   :  { %161 = vmatpush.msra.mxu2 %v144_v26 }
  0x1d   :  { %219 = vmatpush.msra.mxu3 %v144_v26 }
  0x1e   :  { %162 = vmatpush.msra.mxu2 %v143_v27 }
  0x1f   :  { %220 = vmatpush.msra.mxu3 %v143_v27 }
  0x20   :  { %163 = vmatpush.msra.mxu2 %v142_v28 }
  0x21   :  { %221 = vmatpush.msra.mxu3 %v142_v28 }
  0x22   :  { %164 = vmatpush.msra.mxu2 %v141_v29 }
  0x23   :  { %222 = vmatpush.msra.mxu3 %v141_v29 }
  0x24   :  { %165 = vmatpush.msra.mxu2 %v140_v30 }
  0x25   :  { %223 = vmatpush.msra.mxu3 %v140_v30 }
  0x26   :  { %166 = vmatpush.msra.mxu2 %v139_v31 }
  0x27   :  { %224 = vmatpush.msra.mxu3 %v139_v31 }
  0x28   :  { %167 = vmatpush.msra.mxu2 %v138_v32 }
  0x29   :  { %225 = vmatpush.msra.mxu3 %v138_v32 }
  0x2a   :  { %168 = vmatpush.msra.mxu2 %v137_v33 }
  0x2b   :  { %226 = vmatpush.msra.mxu3 %v137_v33 }
  0x8e   :  { %v64_v34 = vpop.f32.mrf.mxu0 }
  0x8f   :  { %v209_v35 = vmul.f32 -1.442695, %v64_v34  ;;  %v87_v52 = vpop.f32.mrf.mxu1 }
  0x91   :  { %231 = vpow2.f32 %v209_v35 }
  0x96   :  { %v67_v36 = vpop.f32.mrf.mxu0 }
  0x97   :  { %v232_v37 = vpop.eup %231  ;;  %v210_v38 = vmul.f32 -1.442695, %v67_v36  ;;  %v90_v2 = vpop.f32.mrf.mxu1 }
  0x98   :  { %v99_v39 = vadd.f32 1.0, %v232_v37 }
  0x99   :  { %233 = vpow2.f32 %v210_v38 }
  0x9a   :  { %235 = vrcp.f32 %v99_v39  ;;  %v112_v46 = vand.u32 2147483648, %v99_v39  ;;  %v110_v48 = vand.u32 2147483647, %v99_v39  ;;  %vm106_vm2 = vweird.f32 %v99_v39 }
  0x9c   :  { %v113_v51 = vor.u32 1.1754944e-38, %v112_v46  ;;  %vm111_vm4 = vcmp.eq.f32.partialorder %v110_v48, 8.507059e+37 }
  0x9f   :  { %v234_v41 = vpop.eup %233 }
  0xa0   :  { %v236_v42 = vpop.eup %235  ;;  %v100_v43 = vadd.f32 1.0, %v234_v41 }
  0xa1   :  { %v102_v44 = vmul.f32 %v236_v42, %v99_v39  ;;  %vm107_vm1 = vweird.f32 %v236_v42 }
  0xa2   :  { %237 = vrcp.f32 %v100_v43  ;;  %vm108_vm3 = vmor %vm106_vm2, %vm107_vm1  ;;  %v127_v58 = vand.u32 2147483648, %v100_v43  ;;  %v125_v60 = vand.u32 2147483647, %v100_v43  ;;  %vm121_vm6 = vweird.f32 %v100_v43 }
  0xa3   :  { %v103_v45 = vsub.f32 1.0, %v102_v44 }
  0xa4   :  { %v128_v63 = vor.u32 1.1754944e-38, %v127_v58  ;;  %vm126_vm8 = vcmp.eq.f32.partialorder %v125_v60, 8.507059e+37 }
  0xa5   :  { %v104_v47 = vmul.f32 %v236_v42, %v103_v45 }
  0xa7   :  { %v105_v49 = vadd.f32 %v236_v42, %v104_v47 }
  0xa8   :  { %v238_v50 = vpop.eup %237 }
  0xa9   :  { %v109_v53 = vsel %vm108_vm3, %v236_v42, %v105_v49  ;;  %v117_v54 = vmul.f32 %v238_v50, %v100_v43  ;;  %vm122_vm5 = vweird.f32 %v238_v50 }
  0xaa   :  { %v114_v55 = vsel %vm111_vm4, %v113_v51, %v109_v53  ;;  %vm123_vm7 = vmor %vm121_vm6, %vm122_vm5 }
  0xab   :  { %v131_v56 = vmul.f32 %v114_v55, %v64_v34  ;;  %v118_v57 = vsub.f32 1.0, %v117_v54 }
  0xad   :  { %v119_v59 = vmul.f32 %v238_v50, %v118_v57  ;;  %v133_v61 = vmul.f32 %v131_v56, %v87_v52 }
  0xaf   :  { %v120_v62 = vadd.f32 %v238_v50, %v119_v59  ;;  %169 = vmatmul.f32.vlgmr.msra.gmra.mxu2 %v133_v61 }
  0xb1   :  { %v124_v0 = vsel %vm123_vm7, %v238_v50, %v120_v62 }
  0xb2   :  { %v129_v1 = vsel %vm126_vm8, %v128_v63, %v124_v0 }
  0xb3   :  { %v132_v3 = vmul.f32 %v129_v1, %v67_v36 }
  0xb5   :  { %v134_v4 = vmul.f32 %v132_v3, %v90_v2 }
  0xb7   :  { %172 = vmatmul.f32.vlgmr.msra.gmra.mxu3 %v134_v4 }
 0x132   :  { %v170_v6 = vpop.f32.mrf.mxu2 }
 0x133   :  { %v176_v7 = vadd.f32 %v170_v6, %v135_v5 }
 0x135   :  { %178 = vst.msk [vmem:[#allocation2] sm:$0xff] %vm19_vm0, %v176_v7 }
 0x13a   :  { %v173_v9 = vpop.f32.mrf.mxu3 }
 0x13b   :  { %v177_v10 = vadd.f32 %v173_v9, %v136_v8 }
 0x13c   :  { %v183_v11 = vld [vmem:[#allocation2] sm:$0xff] }
 0x13d   :  { %179 = vst.msk [vmem:[#allocation2 + $0x8] sm:$0xff] %vm19_vm0, %v177_v10 }
 0x13e   :  { %185 = vst.msk [vmem:[#allocation3] sm:$0xff] %vm19_vm0, %v183_v11 }
 0x144   :  { %v184_v12 = vld [vmem:[#allocation2 + $0x8] sm:$0xff] }
 0x145   :  { %186 = vst.msk [vmem:[#allocation3 + $0x8] sm:$0xff] %vm19_vm0, %v184_v12 }
 0x146   :  { %199 = dma.vmem_to_hbm [thread:$0]  %s192_s23, 256, %s194_s0, [#allocation4], %s267_s26, %s267_s26, %s268_s27  }
 0x147   :  { %263 = dma.done.wait [#allocation4], 256  }
 0x148   :  { %264 = vsyncadd [#allocation4], 4294967040 }
 0x149   :  { %204 = vsyncpa [#allocation4], 1 }

</bundles_post_ra>
